<compile_context>
chip_gen: v5e
topology: v5e:2x2
jax: 0.10.0
libtpu: 0.0.40
codegen_flags: <defaults>
</compile_context>

<pallas_src>
import numpy as np
import jax
import jax.numpy as jnp
from jax import lax
from jax.experimental import pallas as pl
from jax.experimental.pallas import tpu as pltpu

KH = KW = 5
PAD = 2
OUTC = 3
LANE = 128
SUBLANE = 8
TH = 8        # output rows per register block (one sublane tile)
R0 = 8        # sublane-aligned row offset of the image interior inside the scratch

# Fixed SRM filter bank, identical to SRMConv2d_simple._build_kernel (pre-repeat).
_F1 = np.array([[0, 0, 0, 0, 0],
                [0, -1, 2, -1, 0],
                [0, 2, -4, 2, 0],
                [0, -1, 2, -1, 0],
                [0, 0, 0, 0, 0]], dtype=np.float64) / 4.0
_F2 = np.array([[-1, 2, -2, 2, -1],
                [2, -6, 8, -6, 2],
                [-2, 8, -12, 8, -2],
                [2, -6, 8, -6, 2],
                [-1, 2, -2, 2, -1]], dtype=np.float64) / 12.0
_F3 = np.array([[0, 0, 0, 0, 0],
                [0, 0, 0, 0, 0],
                [0, 1, -2, 1, 0],
                [0, 0, 0, 0, 0],
                [0, 0, 0, 0, 0]], dtype=np.float64) / 2.0
_FILTERS = np.stack([_F1, _F2, _F3], axis=0).astype(np.float32)   # (3, 5, 5)


def _round_up(x: int, m: int) -> int:
    return (x + m - 1) // m * m


def _make_srm_kernel(C: int, H: int, W: int, Wo: int, Hs: int, Ws: int):
    """Build the kernel body for fixed (static) shapes."""
    # Per-kh tap lists: (lane shift dw, (w_f1, w_f2, w_f3)); all-zero taps dropped
    # at trace time (37 FMAs total instead of 75).
    taps_by_kh = []
    for kh in range(KH):
        row = []
        for kw in range(KW):
            w3 = tuple(float(_FILTERS[oc, kh, kw]) for oc in range(OUTC))
            if any(w != 0.0 for w in w3):
                row.append((kw - PAD, w3))
        taps_by_kh.append(row)

    n_full = H // TH
    tail = H % TH

    def kernel(x_ref, o_ref, xs_ref):
        # x_ref : (1, C, H, W)   native dtype, raw (unpadded) batch element
        # o_ref : (1, 3, H, Wo)  f32, lane-dense output (Wo % 128 == 0)
        # xs_ref: (Hs, Ws)       f32 scratch; channel-summed image at rows [R0, R0+H),
        #                        cols [0, W); zero pad strips around it.

        # ---- zero only the halo / alignment strips (interior is overwritten below).
        # Done every grid step so no stale data leaks between batch elements.
        xs_ref[R0 - PAD:R0, :] = jnp.zeros((PAD, Ws), jnp.float32)
        xs_ref[R0 + H:, :] = jnp.zeros((Hs - R0 - H, Ws), jnp.float32)
        if Ws > W:
            xs_ref[R0:R0 + H, W:] = jnp.zeros((H, Ws - W), jnp.float32)

        # ---- channel reduction. Valid because the module's weights are np.repeat of
        # the 3 fixed filters over C: conv(x, repeat(f)) == conv(sum_c x[c], f).
        # Cast on load so bf16/uint8 inputs are DMA'd at native width.
        s = x_ref[0, 0, :, :].astype(jnp.float32)
        for ic in range(1, C):
            s = s + x_ref[0, ic, :, :].astype(jnp.float32)
        xs_ref[R0:R0 + H, :W] = s          # sublane-aligned interior store (R0 % 8 == 0)

        def do_block(row0, nrows):
            # Full 25-tap accumulation for one (TH, Ws) output block; the three
            # accumulators stay vreg-resident for the whole block.
            acc = [jnp.zeros((TH, Ws), jnp.float32) for _ in range(OUTC)]
            base = row0 + (R0 - PAD)
            for kh in range(KH):
                row_taps = taps_by_kh[kh]
                if not row_taps:
                    continue
                # One row slab per kh, shared by all lane shifts and all 3 filters.
                slab = xs_ref[pl.ds(base + kh, TH), :]
                for dw, w3 in row_taps:
                    # Lane shift on the XLU; circular wrap lands in zeroed pad columns,
                    # reproducing the conv's zero padding exactly.
                    shifted = slab if dw == 0 else pltpu.roll(slab, (-dw) % Ws, 1)
                    for oc in range(OUTC):
                        if w3[oc] != 0.0:
                            acc[oc] = acc[oc] + w3[oc] * shifted
            # Hardtanh(-3, 3) fused into lane-dense stores.
            for oc in range(OUTC):
                val = jnp.clip(acc[oc][:nrows, :Wo], -3.0, 3.0)
                o_ref[0, oc, pl.ds(row0, nrows), :] = val.astype(o_ref.dtype)

        if n_full > 0:
            if n_full <= 8:
                # Short static trip count: fully unroll for LLO scheduler visibility.
                for rb in range(n_full):
                    do_block(rb * TH, TH)
            else:
                def body(rb, carry):
                    do_block(pl.multiple_of(rb * TH, TH), TH)
                    return carry
                lax.fori_loop(0, n_full, body, 0)
        if tail > 0:
            # Last partial row block: compute TH rows, store only `tail`.
            do_block(n_full * TH, tail)

    return kernel


def srm_conv2d_simple(x: jax.Array) -> jax.Array:
    """x: (B, C, H, W) -> (B, 3, H, W) f32. Matches F.conv2d(pad=2) + Hardtanh(-3, 3)."""
    B, C, H, W = x.shape
    Ho = _round_up(H, SUBLANE)
    Wo = _round_up(W, LANE)
    Ws = _round_up(W + 2 * PAD, LANE)      # >= W + 2 zero columns on the right
    Hs = R0 + Ho + PAD                     # covers the deepest row read (Ho + R0 + 1)

    # Raise the scoped VMEM limit only when the per-step working set needs it.
    itemsize = jnp.dtype(x.dtype).itemsize
    est = (2 * C * H * W * itemsize            # double-buffered input block
           + 2 * OUTC * H * Wo * 4             # double-buffered output block
           + Hs * Ws * 4) + (2 << 20)          # scratch + slack
    cp_kwargs = dict(dimension_semantics=("parallel",))
    if est > (16 << 20):
        cp_kwargs["vmem_limit_bytes"] = int(min(est, 96 << 20))

    out = pl.pallas_call(
        _make_srm_kernel(C, H, W, Wo, Hs, Ws),
        out_shape=jax.ShapeDtypeStruct((B, OUTC, H, Wo), jnp.float32),
        grid=(B,),
        in_specs=[
            # Whole (unpadded, native-dtype) image per batch element; last two block
            # dims equal the full array dims so the (8,128) rule is satisfied.
            pl.BlockSpec((1, C, H, W), lambda b: (b, 0, 0, 0)),
        ],
        # Output block H equals the full array dim (legal even when H % 8 != 0),
        # so only W is lane-padded.
        out_specs=pl.BlockSpec((1, OUTC, H, Wo), lambda b: (b, 0, 0, 0)),
        scratch_shapes=[pltpu.VMEM((Hs, Ws), jnp.float32)],
        compiler_params=pltpu.CompilerParams(**cp_kwargs),
    )(x)

    if Wo == W:
        return out          # no crop pass needed when W is already lane-aligned
    return out[:, :, :, :W]


def _reference_np(x: np.ndarray) -> np.ndarray:
    """NumPy float64 reference: conv2d(x, repeated SRM kernel, pad=2) + Hardtanh(-3,3)."""
    x = np.asarray(x, dtype=np.float64)
    B, C, H, W = x.shape
    w = np.repeat(_FILTERS[:, None, :, :].astype(np.float64), C, axis=1)   # (3, C, 5, 5)
    xp = np.pad(x, ((0, 0), (0, 0), (PAD, PAD), (PAD, PAD)))
    out = np.zeros((B, OUTC, H, W), dtype=np.float64)
    for kh in range(KH):
        for kw in range(KW):
            out += np.einsum('bchw,oc->bohw', xp[:, :, kh:kh + H, kw:kw + W], w[:, :, kh, kw])
    return np.clip(out, -3.0, 3.0).astype(np.float32)


if __name__ == "__main__":
    key = jax.random.PRNGKey(0)
    B, C, H, W = 2, 3, 16, 16                       # inc=3 default of the module
    x = jax.random.normal(key, (B, C, H, W), dtype=jnp.float32)

    out = jax.block_until_ready(srm_conv2d_simple(x))
    assert out.shape == (B, OUTC, H, W)

    ref = _reference_np(np.asarray(x))
    np.testing.assert_allclose(np.asarray(out), ref, rtol=1e-5, atol=1e-4)
    print("KERNEL_OK")
</pallas_src>

<mosaic_0001>
module attributes {stable_mosaic.version = 11 : i64} {
  func.func @kernel(%arg0: i32, %arg1: memref<1x3x16x16xf32, #tpu.memory_space<vmem>>, %arg2: memref<1x3x16x128xf32, #tpu.memory_space<vmem>>, %arg3: memref<26x128xf32, #tpu.memory_space<vmem>>) attributes {dimension_semantics = [#tpu.dimension_semantics<parallel>], iteration_bounds = array<i64: 2>, scalar_prefetch = 0 : i64, scratch_operands = 1 : i64, tpu.core_type = #tpu.core_type<tc>, window_params = [{transform_indices = @transform_0, window_bounds = array<i64: 1, 3, 16, 16>}, {transform_indices = @transform_1, window_bounds = array<i64: 1, 3, 16, 128>}]} {
    %cst = arith.constant 0.000000e+00 : f32
    %0 = vector.broadcast %cst : f32 to vector<2x128xf32>
    %c6 = arith.constant 6 : index
    %c0 = arith.constant 0 : index
    %1 = vector.load %arg3[%c6, %c0] : memref<26x128xf32, #tpu.memory_space<vmem>>, vector<2x128xf32>
    tpu.vector_store %arg3[%c6, %c0], %0 {strides = array<i32>} : memref<26x128xf32, #tpu.memory_space<vmem>>, vector<2x128xf32>,
    %cst_0 = arith.constant 0.000000e+00 : f32
    %2 = vector.broadcast %cst_0 : f32 to vector<2x128xf32>
    %c24 = arith.constant 24 : index
    %c0_1 = arith.constant 0 : index
    %3 = vector.load %arg3[%c24, %c0_1] : memref<26x128xf32, #tpu.memory_space<vmem>>, vector<2x128xf32>
    tpu.vector_store %arg3[%c24, %c0_1], %2 {strides = array<i32>} : memref<26x128xf32, #tpu.memory_space<vmem>>, vector<2x128xf32>,
    %cst_2 = arith.constant 0.000000e+00 : f32
    %4 = vector.broadcast %cst_2 : f32 to vector<16x112xf32>
    %c8 = arith.constant 8 : index
    %c16 = arith.constant 16 : index
    %5 = vector.load %arg3[%c8, %c16] : memref<26x128xf32, #tpu.memory_space<vmem>>, vector<16x112xf32>
    tpu.vector_store %arg3[%c8, %c16], %4 {strides = array<i32>} : memref<26x128xf32, #tpu.memory_space<vmem>>, vector<16x112xf32>,
    %c0_3 = arith.constant 0 : index
    %c0_4 = arith.constant 0 : index
    %c0_5 = arith.constant 0 : index
    %c0_6 = arith.constant 0 : index
    %6 = vector.load %arg1[%c0_3, %c0_4, %c0_5, %c0_6] : memref<1x3x16x16xf32, #tpu.memory_space<vmem>>, vector<1x1x16x16xf32>
    %7 = vector.shape_cast %6 : vector<1x1x16x16xf32> to vector<16x16xf32>
    %c0_7 = arith.constant 0 : index
    %c1 = arith.constant 1 : index
    %c0_8 = arith.constant 0 : index
    %c0_9 = arith.constant 0 : index
    %8 = vector.load %arg1[%c0_7, %c1, %c0_8, %c0_9] : memref<1x3x16x16xf32, #tpu.memory_space<vmem>>, vector<1x1x16x16xf32>
    %9 = vector.shape_cast %8 : vector<1x1x16x16xf32> to vector<16x16xf32>
    %10 = arith.addf %7, %9 : vector<16x16xf32>
    %c0_10 = arith.constant 0 : index
    %c2 = arith.constant 2 : index
    %c0_11 = arith.constant 0 : index
    %c0_12 = arith.constant 0 : index
    %11 = vector.load %arg1[%c0_10, %c2, %c0_11, %c0_12] : memref<1x3x16x16xf32, #tpu.memory_space<vmem>>, vector<1x1x16x16xf32>
    %12 = vector.shape_cast %11 : vector<1x1x16x16xf32> to vector<16x16xf32>
    %13 = arith.addf %10, %12 : vector<16x16xf32>
    %c8_13 = arith.constant 8 : index
    %c0_14 = arith.constant 0 : index
    %14 = vector.load %arg3[%c8_13, %c0_14] : memref<26x128xf32, #tpu.memory_space<vmem>>, vector<16x16xf32>
    tpu.vector_store %arg3[%c8_13, %c0_14], %13 {strides = array<i32>} : memref<26x128xf32, #tpu.memory_space<vmem>>, vector<16x16xf32>,
    %cst_15 = arith.constant 0.000000e+00 : f32
    %15 = vector.broadcast %cst_15 : f32 to vector<8x128xf32>
    %cst_16 = arith.constant 0.000000e+00 : f32
    %16 = vector.broadcast %cst_16 : f32 to vector<8x128xf32>
    %cst_17 = arith.constant 0.000000e+00 : f32
    %17 = vector.broadcast %cst_17 : f32 to vector<8x128xf32>
    %c6_18 = arith.constant 6 : index
    %c0_19 = arith.constant 0 : index
    %18 = vector.load %arg3[%c6_18, %c0_19] : memref<26x128xf32, #tpu.memory_space<vmem>>, vector<8x128xf32>
    %c2_i32 = arith.constant 2 : i32
    %19 = tpu.dynamic_rotate %18 by %c2_i32 dim 1 : vector<8x128xf32>, i32 -> vector<8x128xf32>
    %cst_20 = arith.constant -0.0833333358 : f32
    %20 = vector.broadcast %cst_20 : f32 to vector<8x128xf32>
    %21 = arith.mulf %20, %19 : vector<8x128xf32>
    %22 = arith.addf %16, %21 : vector<8x128xf32>
    %c1_i32 = arith.constant 1 : i32
    %23 = tpu.dynamic_rotate %18 by %c1_i32 dim 1 : vector<8x128xf32>, i32 -> vector<8x128xf32>
    %cst_21 = arith.constant 0.166666672 : f32
    %24 = vector.broadcast %cst_21 : f32 to vector<8x128xf32>
    %25 = arith.mulf %24, %23 : vector<8x128xf32>
    %26 = arith.addf %22, %25 : vector<8x128xf32>
    %cst_22 = arith.constant -0.166666672 : f32
    %27 = vector.broadcast %cst_22 : f32 to vector<8x128xf32>
    %28 = arith.mulf %27, %18 : vector<8x128xf32>
    %29 = arith.addf %26, %28 : vector<8x128xf32>
    %c127_i32 = arith.constant 127 : i32
    %30 = tpu.dynamic_rotate %18 by %c127_i32 dim 1 : vector<8x128xf32>, i32 -> vector<8x128xf32>
    %cst_23 = arith.constant 0.166666672 : f32
    %31 = vector.broadcast %cst_23 : f32 to vector<8x128xf32>
    %32 = arith.mulf %31, %30 : vector<8x128xf32>
    %33 = arith.addf %29, %32 : vector<8x128xf32>
    %c126_i32 = arith.constant 126 : i32
    %34 = tpu.dynamic_rotate %18 by %c126_i32 dim 1 : vector<8x128xf32>, i32 -> vector<8x128xf32>
    %cst_24 = arith.constant -0.0833333358 : f32
    %35 = vector.broadcast %cst_24 : f32 to vector<8x128xf32>
    %36 = arith.mulf %35, %34 : vector<8x128xf32>
    %37 = arith.addf %33, %36 : vector<8x128xf32>
    %c7 = arith.constant 7 : index
    %c0_25 = arith.constant 0 : index
    %38 = vector.load %arg3[%c7, %c0_25] : memref<26x128xf32, #tpu.memory_space<vmem>>, vector<8x128xf32>
    %c2_i32_26 = arith.constant 2 : i32
    %39 = tpu.dynamic_rotate %38 by %c2_i32_26 dim 1 : vector<8x128xf32>, i32 -> vector<8x128xf32>
    %cst_27 = arith.constant 0.166666672 : f32
    %40 = vector.broadcast %cst_27 : f32 to vector<8x128xf32>
    %41 = arith.mulf %40, %39 : vector<8x128xf32>
    %42 = arith.addf %37, %41 : vector<8x128xf32>
    %c1_i32_28 = arith.constant 1 : i32
    %43 = tpu.dynamic_rotate %38 by %c1_i32_28 dim 1 : vector<8x128xf32>, i32 -> vector<8x128xf32>
    %cst_29 = arith.constant -2.500000e-01 : f32
    %44 = vector.broadcast %cst_29 : f32 to vector<8x128xf32>
    %45 = arith.mulf %44, %43 : vector<8x128xf32>
    %46 = arith.addf %15, %45 : vector<8x128xf32>
    %cst_30 = arith.constant -5.000000e-01 : f32
    %47 = vector.broadcast %cst_30 : f32 to vector<8x128xf32>
    %48 = arith.mulf %47, %43 : vector<8x128xf32>
    %49 = arith.addf %42, %48 : vector<8x128xf32>
    %cst_31 = arith.constant 5.000000e-01 : f32
    %50 = vector.broadcast %cst_31 : f32 to vector<8x128xf32>
    %51 = arith.mulf %50, %38 : vector<8x128xf32>
    %52 = arith.addf %46, %51 : vector<8x128xf32>
    %cst_32 = arith.constant 0.666666686 : f32
    %53 = vector.broadcast %cst_32 : f32 to vector<8x128xf32>
    %54 = arith.mulf %53, %38 : vector<8x128xf32>
    %55 = arith.addf %49, %54 : vector<8x128xf32>
    %c127_i32_33 = arith.constant 127 : i32
    %56 = tpu.dynamic_rotate %38 by %c127_i32_33 dim 1 : vector<8x128xf32>, i32 -> vector<8x128xf32>
    %cst_34 = arith.constant -2.500000e-01 : f32
    %57 = vector.broadcast %cst_34 : f32 to vector<8x128xf32>
    %58 = arith.mulf %57, %56 : vector<8x128xf32>
    %59 = arith.addf %52, %58 : vector<8x128xf32>
    %cst_35 = arith.constant -5.000000e-01 : f32
    %60 = vector.broadcast %cst_35 : f32 to vector<8x128xf32>
    %61 = arith.mulf %60, %56 : vector<8x128xf32>
    %62 = arith.addf %55, %61 : vector<8x128xf32>
    %c126_i32_36 = arith.constant 126 : i32
    %63 = tpu.dynamic_rotate %38 by %c126_i32_36 dim 1 : vector<8x128xf32>, i32 -> vector<8x128xf32>
    %cst_37 = arith.constant 0.166666672 : f32
    %64 = vector.broadcast %cst_37 : f32 to vector<8x128xf32>
    %65 = arith.mulf %64, %63 : vector<8x128xf32>
    %66 = arith.addf %62, %65 : vector<8x128xf32>
    %c8_38 = arith.constant 8 : index
    %c0_39 = arith.constant 0 : index
    %67 = vector.load %arg3[%c8_38, %c0_39] : memref<26x128xf32, #tpu.memory_space<vmem>>, vector<8x128xf32>
    %c2_i32_40 = arith.constant 2 : i32
    %68 = tpu.dynamic_rotate %67 by %c2_i32_40 dim 1 : vector<8x128xf32>, i32 -> vector<8x128xf32>
    %cst_41 = arith.constant -0.166666672 : f32
    %69 = vector.broadcast %cst_41 : f32 to vector<8x128xf32>
    %70 = arith.mulf %69, %68 : vector<8x128xf32>
    %71 = arith.addf %66, %70 : vector<8x128xf32>
    %c1_i32_42 = arith.constant 1 : i32
    %72 = tpu.dynamic_rotate %67 by %c1_i32_42 dim 1 : vector<8x128xf32>, i32 -> vector<8x128xf32>
    %cst_43 = arith.constant 5.000000e-01 : f32
    %73 = vector.broadcast %cst_43 : f32 to vector<8x128xf32>
    %74 = arith.mulf %73, %72 : vector<8x128xf32>
    %75 = arith.addf %59, %74 : vector<8x128xf32>
    %cst_44 = arith.constant 0.666666686 : f32
    %76 = vector.broadcast %cst_44 : f32 to vector<8x128xf32>
    %77 = arith.mulf %76, %72 : vector<8x128xf32>
    %78 = arith.addf %71, %77 : vector<8x128xf32>
    %cst_45 = arith.constant 5.000000e-01 : f32
    %79 = vector.broadcast %cst_45 : f32 to vector<8x128xf32>
    %80 = arith.mulf %79, %72 : vector<8x128xf32>
    %81 = arith.addf %17, %80 : vector<8x128xf32>
    %cst_46 = arith.constant -1.000000e+00 : f32
    %82 = vector.broadcast %cst_46 : f32 to vector<8x128xf32>
    %83 = arith.mulf %82, %67 : vector<8x128xf32>
    %84 = arith.addf %75, %83 : vector<8x128xf32>
    %cst_47 = arith.constant -1.000000e+00 : f32
    %85 = vector.broadcast %cst_47 : f32 to vector<8x128xf32>
    %86 = arith.mulf %85, %67 : vector<8x128xf32>
    %87 = arith.addf %78, %86 : vector<8x128xf32>
    %cst_48 = arith.constant -1.000000e+00 : f32
    %88 = vector.broadcast %cst_48 : f32 to vector<8x128xf32>
    %89 = arith.mulf %88, %67 : vector<8x128xf32>
    %90 = arith.addf %81, %89 : vector<8x128xf32>
    %c127_i32_49 = arith.constant 127 : i32
    %91 = tpu.dynamic_rotate %67 by %c127_i32_49 dim 1 : vector<8x128xf32>, i32 -> vector<8x128xf32>
    %cst_50 = arith.constant 5.000000e-01 : f32
    %92 = vector.broadcast %cst_50 : f32 to vector<8x128xf32>
    %93 = arith.mulf %92, %91 : vector<8x128xf32>
    %94 = arith.addf %84, %93 : vector<8x128xf32>
    %cst_51 = arith.constant 0.666666686 : f32
    %95 = vector.broadcast %cst_51 : f32 to vector<8x128xf32>
    %96 = arith.mulf %95, %91 : vector<8x128xf32>
    %97 = arith.addf %87, %96 : vector<8x128xf32>
    %cst_52 = arith.constant 5.000000e-01 : f32
    %98 = vector.broadcast %cst_52 : f32 to vector<8x128xf32>
    %99 = arith.mulf %98, %91 : vector<8x128xf32>
    %100 = arith.addf %90, %99 : vector<8x128xf32>
    %c126_i32_53 = arith.constant 126 : i32
    %101 = tpu.dynamic_rotate %67 by %c126_i32_53 dim 1 : vector<8x128xf32>, i32 -> vector<8x128xf32>
    %cst_54 = arith.constant -0.166666672 : f32
    %102 = vector.broadcast %cst_54 : f32 to vector<8x128xf32>
    %103 = arith.mulf %102, %101 : vector<8x128xf32>
    %104 = arith.addf %97, %103 : vector<8x128xf32>
    %c9 = arith.constant 9 : index
    %c0_55 = arith.constant 0 : index
    %105 = vector.load %arg3[%c9, %c0_55] : memref<26x128xf32, #tpu.memory_space<vmem>>, vector<8x128xf32>
    %c2_i32_56 = arith.constant 2 : i32
    %106 = tpu.dynamic_rotate %105 by %c2_i32_56 dim 1 : vector<8x128xf32>, i32 -> vector<8x128xf32>
    %cst_57 = arith.constant 0.166666672 : f32
    %107 = vector.broadcast %cst_57 : f32 to vector<8x128xf32>
    %108 = arith.mulf %107, %106 : vector<8x128xf32>
    %109 = arith.addf %104, %108 : vector<8x128xf32>
    %c1_i32_58 = arith.constant 1 : i32
    %110 = tpu.dynamic_rotate %105 by %c1_i32_58 dim 1 : vector<8x128xf32>, i32 -> vector<8x128xf32>
    %cst_59 = arith.constant -2.500000e-01 : f32
    %111 = vector.broadcast %cst_59 : f32 to vector<8x128xf32>
    %112 = arith.mulf %111, %110 : vector<8x128xf32>
    %113 = arith.addf %94, %112 : vector<8x128xf32>
    %cst_60 = arith.constant -5.000000e-01 : f32
    %114 = vector.broadcast %cst_60 : f32 to vector<8x128xf32>
    %115 = arith.mulf %114, %110 : vector<8x128xf32>
    %116 = arith.addf %109, %115 : vector<8x128xf32>
    %cst_61 = arith.constant 5.000000e-01 : f32
    %117 = vector.broadcast %cst_61 : f32 to vector<8x128xf32>
    %118 = arith.mulf %117, %105 : vector<8x128xf32>
    %119 = arith.addf %113, %118 : vector<8x128xf32>
    %cst_62 = arith.constant 0.666666686 : f32
    %120 = vector.broadcast %cst_62 : f32 to vector<8x128xf32>
    %121 = arith.mulf %120, %105 : vector<8x128xf32>
    %122 = arith.addf %116, %121 : vector<8x128xf32>
    %c127_i32_63 = arith.constant 127 : i32
    %123 = tpu.dynamic_rotate %105 by %c127_i32_63 dim 1 : vector<8x128xf32>, i32 -> vector<8x128xf32>
    %cst_64 = arith.constant -2.500000e-01 : f32
    %124 = vector.broadcast %cst_64 : f32 to vector<8x128xf32>
    %125 = arith.mulf %124, %123 : vector<8x128xf32>
    %126 = arith.addf %119, %125 : vector<8x128xf32>
    %cst_65 = arith.constant -5.000000e-01 : f32
    %127 = vector.broadcast %cst_65 : f32 to vector<8x128xf32>
    %128 = arith.mulf %127, %123 : vector<8x128xf32>
    %129 = arith.addf %122, %128 : vector<8x128xf32>
    %c126_i32_66 = arith.constant 126 : i32
    %130 = tpu.dynamic_rotate %105 by %c126_i32_66 dim 1 : vector<8x128xf32>, i32 -> vector<8x128xf32>
    %cst_67 = arith.constant 0.166666672 : f32
    %131 = vector.broadcast %cst_67 : f32 to vector<8x128xf32>
    %132 = arith.mulf %131, %130 : vector<8x128xf32>
    %133 = arith.addf %129, %132 : vector<8x128xf32>
    %c10 = arith.constant 10 : index
    %c0_68 = arith.constant 0 : index
    %134 = vector.load %arg3[%c10, %c0_68] : memref<26x128xf32, #tpu.memory_space<vmem>>, vector<8x128xf32>
    %c2_i32_69 = arith.constant 2 : i32
    %135 = tpu.dynamic_rotate %134 by %c2_i32_69 dim 1 : vector<8x128xf32>, i32 -> vector<8x128xf32>
    %cst_70 = arith.constant -0.0833333358 : f32
    %136 = vector.broadcast %cst_70 : f32 to vector<8x128xf32>
    %137 = arith.mulf %136, %135 : vector<8x128xf32>
    %138 = arith.addf %133, %137 : vector<8x128xf32>
    %c1_i32_71 = arith.constant 1 : i32
    %139 = tpu.dynamic_rotate %134 by %c1_i32_71 dim 1 : vector<8x128xf32>, i32 -> vector<8x128xf32>
    %cst_72 = arith.constant 0.166666672 : f32
    %140 = vector.broadcast %cst_72 : f32 to vector<8x128xf32>
    %141 = arith.mulf %140, %139 : vector<8x128xf32>
    %142 = arith.addf %138, %141 : vector<8x128xf32>
    %cst_73 = arith.constant -0.166666672 : f32
    %143 = vector.broadcast %cst_73 : f32 to vector<8x128xf32>
    %144 = arith.mulf %143, %134 : vector<8x128xf32>
    %145 = arith.addf %142, %144 : vector<8x128xf32>
    %c127_i32_74 = arith.constant 127 : i32
    %146 = tpu.dynamic_rotate %134 by %c127_i32_74 dim 1 : vector<8x128xf32>, i32 -> vector<8x128xf32>
    %cst_75 = arith.constant 0.166666672 : f32
    %147 = vector.broadcast %cst_75 : f32 to vector<8x128xf32>
    %148 = arith.mulf %147, %146 : vector<8x128xf32>
    %149 = arith.addf %145, %148 : vector<8x128xf32>
    %c126_i32_76 = arith.constant 126 : i32
    %150 = tpu.dynamic_rotate %134 by %c126_i32_76 dim 1 : vector<8x128xf32>, i32 -> vector<8x128xf32>
    %cst_77 = arith.constant -0.0833333358 : f32
    %151 = vector.broadcast %cst_77 : f32 to vector<8x128xf32>
    %152 = arith.mulf %151, %150 : vector<8x128xf32>
    %153 = arith.addf %149, %152 : vector<8x128xf32>
    %cst_78 = arith.constant -3.000000e+00 : f32
    %cst_79 = arith.constant 3.000000e+00 : f32
    %154 = vector.broadcast %cst_78 : f32 to vector<8x128xf32>
    %155 = arith.maximumf %154, %126 : vector<8x128xf32>
    %156 = vector.broadcast %cst_79 : f32 to vector<8x128xf32>
    %157 = arith.minimumf %156, %155 : vector<8x128xf32>
    %c0_80 = arith.constant 0 : index
    %c0_81 = arith.constant 0 : index
    %c0_82 = arith.constant 0 : index
    %c0_83 = arith.constant 0 : index
    %158 = vector.load %arg2[%c0_80, %c0_81, %c0_82, %c0_83] : memref<1x3x16x128xf32, #tpu.memory_space<vmem>>, vector<1x1x8x128xf32>
    %159 = vector.shape_cast %158 : vector<1x1x8x128xf32> to vector<8x128xf32>
    %160 = vector.shape_cast %157 : vector<8x128xf32> to vector<1x1x8x128xf32>
    tpu.vector_store %arg2[%c0_80, %c0_81, %c0_82, %c0_83], %160 {strides = array<i32>} : memref<1x3x16x128xf32, #tpu.memory_space<vmem>>, vector<1x1x8x128xf32>,
    %cst_84 = arith.constant -3.000000e+00 : f32
    %cst_85 = arith.constant 3.000000e+00 : f32
    %161 = vector.broadcast %cst_84 : f32 to vector<8x128xf32>
    %162 = arith.maximumf %161, %153 : vector<8x128xf32>
    %163 = vector.broadcast %cst_85 : f32 to vector<8x128xf32>
    %164 = arith.minimumf %163, %162 : vector<8x128xf32>
    %c0_86 = arith.constant 0 : index
    %c1_87 = arith.constant 1 : index
    %c0_88 = arith.constant 0 : index
    %c0_89 = arith.constant 0 : index
    %165 = vector.load %arg2[%c0_86, %c1_87, %c0_88, %c0_89] : memref<1x3x16x128xf32, #tpu.memory_space<vmem>>, vector<1x1x8x128xf32>
    %166 = vector.shape_cast %165 : vector<1x1x8x128xf32> to vector<8x128xf32>
    %167 = vector.shape_cast %164 : vector<8x128xf32> to vector<1x1x8x128xf32>
    tpu.vector_store %arg2[%c0_86, %c1_87, %c0_88, %c0_89], %167 {strides = array<i32>} : memref<1x3x16x128xf32, #tpu.memory_space<vmem>>, vector<1x1x8x128xf32>,
    %cst_90 = arith.constant -3.000000e+00 : f32
    %cst_91 = arith.constant 3.000000e+00 : f32
    %168 = vector.broadcast %cst_90 : f32 to vector<8x128xf32>
    %169 = arith.maximumf %168, %100 : vector<8x128xf32>
    %170 = vector.broadcast %cst_91 : f32 to vector<8x128xf32>
    %171 = arith.minimumf %170, %169 : vector<8x128xf32>
    %c0_92 = arith.constant 0 : index
    %c2_93 = arith.constant 2 : index
    %c0_94 = arith.constant 0 : index
    %c0_95 = arith.constant 0 : index
    %172 = vector.load %arg2[%c0_92, %c2_93, %c0_94, %c0_95] : memref<1x3x16x128xf32, #tpu.memory_space<vmem>>, vector<1x1x8x128xf32>
    %173 = vector.shape_cast %172 : vector<1x1x8x128xf32> to vector<8x128xf32>
    %174 = vector.shape_cast %171 : vector<8x128xf32> to vector<1x1x8x128xf32>
    tpu.vector_store %arg2[%c0_92, %c2_93, %c0_94, %c0_95], %174 {strides = array<i32>} : memref<1x3x16x128xf32, #tpu.memory_space<vmem>>, vector<1x1x8x128xf32>,
    %cst_96 = arith.constant 0.000000e+00 : f32
    %175 = vector.broadcast %cst_96 : f32 to vector<8x128xf32>
    %cst_97 = arith.constant 0.000000e+00 : f32
    %176 = vector.broadcast %cst_97 : f32 to vector<8x128xf32>
    %cst_98 = arith.constant 0.000000e+00 : f32
    %177 = vector.broadcast %cst_98 : f32 to vector<8x128xf32>
    %c14 = arith.constant 14 : index
    %c0_99 = arith.constant 0 : index
    %178 = vector.load %arg3[%c14, %c0_99] : memref<26x128xf32, #tpu.memory_space<vmem>>, vector<8x128xf32>
    %c2_i32_100 = arith.constant 2 : i32
    %179 = tpu.dynamic_rotate %178 by %c2_i32_100 dim 1 : vector<8x128xf32>, i32 -> vector<8x128xf32>
    %cst_101 = arith.constant -0.0833333358 : f32
    %180 = vector.broadcast %cst_101 : f32 to vector<8x128xf32>
    %181 = arith.mulf %180, %179 : vector<8x128xf32>
    %182 = arith.addf %176, %181 : vector<8x128xf32>
    %c1_i32_102 = arith.constant 1 : i32
    %183 = tpu.dynamic_rotate %178 by %c1_i32_102 dim 1 : vector<8x128xf32>, i32 -> vector<8x128xf32>
    %cst_103 = arith.constant 0.166666672 : f32
    %184 = vector.broadcast %cst_103 : f32 to vector<8x128xf32>
    %185 = arith.mulf %184, %183 : vector<8x128xf32>
    %186 = arith.addf %182, %185 : vector<8x128xf32>
    %cst_104 = arith.constant -0.166666672 : f32
    %187 = vector.broadcast %cst_104 : f32 to vector<8x128xf32>
    %188 = arith.mulf %187, %178 : vector<8x128xf32>
    %189 = arith.addf %186, %188 : vector<8x128xf32>
    %c127_i32_105 = arith.constant 127 : i32
    %190 = tpu.dynamic_rotate %178 by %c127_i32_105 dim 1 : vector<8x128xf32>, i32 -> vector<8x128xf32>
    %cst_106 = arith.constant 0.166666672 : f32
    %191 = vector.broadcast %cst_106 : f32 to vector<8x128xf32>
    %192 = arith.mulf %191, %190 : vector<8x128xf32>
    %193 = arith.addf %189, %192 : vector<8x128xf32>
    %c126_i32_107 = arith.constant 126 : i32
    %194 = tpu.dynamic_rotate %178 by %c126_i32_107 dim 1 : vector<8x128xf32>, i32 -> vector<8x128xf32>
    %cst_108 = arith.constant -0.0833333358 : f32
    %195 = vector.broadcast %cst_108 : f32 to vector<8x128xf32>
    %196 = arith.mulf %195, %194 : vector<8x128xf32>
    %197 = arith.addf %193, %196 : vector<8x128xf32>
    %c15 = arith.constant 15 : index
    %c0_109 = arith.constant 0 : index
    %198 = vector.load %arg3[%c15, %c0_109] : memref<26x128xf32, #tpu.memory_space<vmem>>, vector<8x128xf32>
    %c2_i32_110 = arith.constant 2 : i32
    %199 = tpu.dynamic_rotate %198 by %c2_i32_110 dim 1 : vector<8x128xf32>, i32 -> vector<8x128xf32>
    %cst_111 = arith.constant 0.166666672 : f32
    %200 = vector.broadcast %cst_111 : f32 to vector<8x128xf32>
    %201 = arith.mulf %200, %199 : vector<8x128xf32>
    %202 = arith.addf %197, %201 : vector<8x128xf32>
    %c1_i32_112 = arith.constant 1 : i32
    %203 = tpu.dynamic_rotate %198 by %c1_i32_112 dim 1 : vector<8x128xf32>, i32 -> vector<8x128xf32>
    %cst_113 = arith.constant -2.500000e-01 : f32
    %204 = vector.broadcast %cst_113 : f32 to vector<8x128xf32>
    %205 = arith.mulf %204, %203 : vector<8x128xf32>
    %206 = arith.addf %175, %205 : vector<8x128xf32>
    %cst_114 = arith.constant -5.000000e-01 : f32
    %207 = vector.broadcast %cst_114 : f32 to vector<8x128xf32>
    %208 = arith.mulf %207, %203 : vector<8x128xf32>
    %209 = arith.addf %202, %208 : vector<8x128xf32>
    %cst_115 = arith.constant 5.000000e-01 : f32
    %210 = vector.broadcast %cst_115 : f32 to vector<8x128xf32>
    %211 = arith.mulf %210, %198 : vector<8x128xf32>
    %212 = arith.addf %206, %211 : vector<8x128xf32>
    %cst_116 = arith.constant 0.666666686 : f32
    %213 = vector.broadcast %cst_116 : f32 to vector<8x128xf32>
    %214 = arith.mulf %213, %198 : vector<8x128xf32>
    %215 = arith.addf %209, %214 : vector<8x128xf32>
    %c127_i32_117 = arith.constant 127 : i32
    %216 = tpu.dynamic_rotate %198 by %c127_i32_117 dim 1 : vector<8x128xf32>, i32 -> vector<8x128xf32>
    %cst_118 = arith.constant -2.500000e-01 : f32
    %217 = vector.broadcast %cst_118 : f32 to vector<8x128xf32>
    %218 = arith.mulf %217, %216 : vector<8x128xf32>
    %219 = arith.addf %212, %218 : vector<8x128xf32>
    %cst_119 = arith.constant -5.000000e-01 : f32
    %220 = vector.broadcast %cst_119 : f32 to vector<8x128xf32>
    %221 = arith.mulf %220, %216 : vector<8x128xf32>
    %222 = arith.addf %215, %221 : vector<8x128xf32>
    %c126_i32_120 = arith.constant 126 : i32
    %223 = tpu.dynamic_rotate %198 by %c126_i32_120 dim 1 : vector<8x128xf32>, i32 -> vector<8x128xf32>
    %cst_121 = arith.constant 0.166666672 : f32
    %224 = vector.broadcast %cst_121 : f32 to vector<8x128xf32>
    %225 = arith.mulf %224, %223 : vector<8x128xf32>
    %226 = arith.addf %222, %225 : vector<8x128xf32>
    %c16_122 = arith.constant 16 : index
    %c0_123 = arith.constant 0 : index
    %227 = vector.load %arg3[%c16_122, %c0_123] : memref<26x128xf32, #tpu.memory_space<vmem>>, vector<8x128xf32>
    %c2_i32_124 = arith.constant 2 : i32
    %228 = tpu.dynamic_rotate %227 by %c2_i32_124 dim 1 : vector<8x128xf32>, i32 -> vector<8x128xf32>
    %cst_125 = arith.constant -0.166666672 : f32
    %229 = vector.broadcast %cst_125 : f32 to vector<8x128xf32>
    %230 = arith.mulf %229, %228 : vector<8x128xf32>
    %231 = arith.addf %226, %230 : vector<8x128xf32>
    %c1_i32_126 = arith.constant 1 : i32
    %232 = tpu.dynamic_rotate %227 by %c1_i32_126 dim 1 : vector<8x128xf32>, i32 -> vector<8x128xf32>
    %cst_127 = arith.constant 5.000000e-01 : f32
    %233 = vector.broadcast %cst_127 : f32 to vector<8x128xf32>
    %234 = arith.mulf %233, %232 : vector<8x128xf32>
    %235 = arith.addf %219, %234 : vector<8x128xf32>
    %cst_128 = arith.constant 0.666666686 : f32
    %236 = vector.broadcast %cst_128 : f32 to vector<8x128xf32>
    %237 = arith.mulf %236, %232 : vector<8x128xf32>
    %238 = arith.addf %231, %237 : vector<8x128xf32>
    %cst_129 = arith.constant 5.000000e-01 : f32
    %239 = vector.broadcast %cst_129 : f32 to vector<8x128xf32>
    %240 = arith.mulf %239, %232 : vector<8x128xf32>
    %241 = arith.addf %177, %240 : vector<8x128xf32>
    %cst_130 = arith.constant -1.000000e+00 : f32
    %242 = vector.broadcast %cst_130 : f32 to vector<8x128xf32>
    %243 = arith.mulf %242, %227 : vector<8x128xf32>
    %244 = arith.addf %235, %243 : vector<8x128xf32>
    %cst_131 = arith.constant -1.000000e+00 : f32
    %245 = vector.broadcast %cst_131 : f32 to vector<8x128xf32>
    %246 = arith.mulf %245, %227 : vector<8x128xf32>
    %247 = arith.addf %238, %246 : vector<8x128xf32>
    %cst_132 = arith.constant -1.000000e+00 : f32
    %248 = vector.broadcast %cst_132 : f32 to vector<8x128xf32>
    %249 = arith.mulf %248, %227 : vector<8x128xf32>
    %250 = arith.addf %241, %249 : vector<8x128xf32>
    %c127_i32_133 = arith.constant 127 : i32
    %251 = tpu.dynamic_rotate %227 by %c127_i32_133 dim 1 : vector<8x128xf32>, i32 -> vector<8x128xf32>
    %cst_134 = arith.constant 5.000000e-01 : f32
    %252 = vector.broadcast %cst_134 : f32 to vector<8x128xf32>
    %253 = arith.mulf %252, %251 : vector<8x128xf32>
    %254 = arith.addf %244, %253 : vector<8x128xf32>
    %cst_135 = arith.constant 0.666666686 : f32
    %255 = vector.broadcast %cst_135 : f32 to vector<8x128xf32>
    %256 = arith.mulf %255, %251 : vector<8x128xf32>
    %257 = arith.addf %247, %256 : vector<8x128xf32>
    %cst_136 = arith.constant 5.000000e-01 : f32
    %258 = vector.broadcast %cst_136 : f32 to vector<8x128xf32>
    %259 = arith.mulf %258, %251 : vector<8x128xf32>
    %260 = arith.addf %250, %259 : vector<8x128xf32>
    %c126_i32_137 = arith.constant 126 : i32
    %261 = tpu.dynamic_rotate %227 by %c126_i32_137 dim 1 : vector<8x128xf32>, i32 -> vector<8x128xf32>
    %cst_138 = arith.constant -0.166666672 : f32
    %262 = vector.broadcast %cst_138 : f32 to vector<8x128xf32>
    %263 = arith.mulf %262, %261 : vector<8x128xf32>
    %264 = arith.addf %257, %263 : vector<8x128xf32>
    %c17 = arith.constant 17 : index
    %c0_139 = arith.constant 0 : index
    %265 = vector.load %arg3[%c17, %c0_139] : memref<26x128xf32, #tpu.memory_space<vmem>>, vector<8x128xf32>
    %c2_i32_140 = arith.constant 2 : i32
    %266 = tpu.dynamic_rotate %265 by %c2_i32_140 dim 1 : vector<8x128xf32>, i32 -> vector<8x128xf32>
    %cst_141 = arith.constant 0.166666672 : f32
    %267 = vector.broadcast %cst_141 : f32 to vector<8x128xf32>
    %268 = arith.mulf %267, %266 : vector<8x128xf32>
    %269 = arith.addf %264, %268 : vector<8x128xf32>
    %c1_i32_142 = arith.constant 1 : i32
    %270 = tpu.dynamic_rotate %265 by %c1_i32_142 dim 1 : vector<8x128xf32>, i32 -> vector<8x128xf32>
    %cst_143 = arith.constant -2.500000e-01 : f32
    %271 = vector.broadcast %cst_143 : f32 to vector<8x128xf32>
    %272 = arith.mulf %271, %270 : vector<8x128xf32>
    %273 = arith.addf %254, %272 : vector<8x128xf32>
    %cst_144 = arith.constant -5.000000e-01 : f32
    %274 = vector.broadcast %cst_144 : f32 to vector<8x128xf32>
    %275 = arith.mulf %274, %270 : vector<8x128xf32>
    %276 = arith.addf %269, %275 : vector<8x128xf32>
    %cst_145 = arith.constant 5.000000e-01 : f32
    %277 = vector.broadcast %cst_145 : f32 to vector<8x128xf32>
    %278 = arith.mulf %277, %265 : vector<8x128xf32>
    %279 = arith.addf %273, %278 : vector<8x128xf32>
    %cst_146 = arith.constant 0.666666686 : f32
    %280 = vector.broadcast %cst_146 : f32 to vector<8x128xf32>
    %281 = arith.mulf %280, %265 : vector<8x128xf32>
    %282 = arith.addf %276, %281 : vector<8x128xf32>
    %c127_i32_147 = arith.constant 127 : i32
    %283 = tpu.dynamic_rotate %265 by %c127_i32_147 dim 1 : vector<8x128xf32>, i32 -> vector<8x128xf32>
    %cst_148 = arith.constant -2.500000e-01 : f32
    %284 = vector.broadcast %cst_148 : f32 to vector<8x128xf32>
    %285 = arith.mulf %284, %283 : vector<8x128xf32>
    %286 = arith.addf %279, %285 : vector<8x128xf32>
    %cst_149 = arith.constant -5.000000e-01 : f32
    %287 = vector.broadcast %cst_149 : f32 to vector<8x128xf32>
    %288 = arith.mulf %287, %283 : vector<8x128xf32>
    %289 = arith.addf %282, %288 : vector<8x128xf32>
    %c126_i32_150 = arith.constant 126 : i32
    %290 = tpu.dynamic_rotate %265 by %c126_i32_150 dim 1 : vector<8x128xf32>, i32 -> vector<8x128xf32>
    %cst_151 = arith.constant 0.166666672 : f32
    %291 = vector.broadcast %cst_151 : f32 to vector<8x128xf32>
    %292 = arith.mulf %291, %290 : vector<8x128xf32>
    %293 = arith.addf %289, %292 : vector<8x128xf32>
    %c18 = arith.constant 18 : index
    %c0_152 = arith.constant 0 : index
    %294 = vector.load %arg3[%c18, %c0_152] : memref<26x128xf32, #tpu.memory_space<vmem>>, vector<8x128xf32>
    %c2_i32_153 = arith.constant 2 : i32
    %295 = tpu.dynamic_rotate %294 by %c2_i32_153 dim 1 : vector<8x128xf32>, i32 -> vector<8x128xf32>
    %cst_154 = arith.constant -0.0833333358 : f32
    %296 = vector.broadcast %cst_154 : f32 to vector<8x128xf32>
    %297 = arith.mulf %296, %295 : vector<8x128xf32>
    %298 = arith.addf %293, %297 : vector<8x128xf32>
    %c1_i32_155 = arith.constant 1 : i32
    %299 = tpu.dynamic_rotate %294 by %c1_i32_155 dim 1 : vector<8x128xf32>, i32 -> vector<8x128xf32>
    %cst_156 = arith.constant 0.166666672 : f32
    %300 = vector.broadcast %cst_156 : f32 to vector<8x128xf32>
    %301 = arith.mulf %300, %299 : vector<8x128xf32>
    %302 = arith.addf %298, %301 : vector<8x128xf32>
    %cst_157 = arith.constant -0.166666672 : f32
    %303 = vector.broadcast %cst_157 : f32 to vector<8x128xf32>
    %304 = arith.mulf %303, %294 : vector<8x128xf32>
    %305 = arith.addf %302, %304 : vector<8x128xf32>
    %c127_i32_158 = arith.constant 127 : i32
    %306 = tpu.dynamic_rotate %294 by %c127_i32_158 dim 1 : vector<8x128xf32>, i32 -> vector<8x128xf32>
    %cst_159 = arith.constant 0.166666672 : f32
    %307 = vector.broadcast %cst_159 : f32 to vector<8x128xf32>
    %308 = arith.mulf %307, %306 : vector<8x128xf32>
    %309 = arith.addf %305, %308 : vector<8x128xf32>
    %c126_i32_160 = arith.constant 126 : i32
    %310 = tpu.dynamic_rotate %294 by %c126_i32_160 dim 1 : vector<8x128xf32>, i32 -> vector<8x128xf32>
    %cst_161 = arith.constant -0.0833333358 : f32
    %311 = vector.broadcast %cst_161 : f32 to vector<8x128xf32>
    %312 = arith.mulf %311, %310 : vector<8x128xf32>
    %313 = arith.addf %309, %312 : vector<8x128xf32>
    %cst_162 = arith.constant -3.000000e+00 : f32
    %cst_163 = arith.constant 3.000000e+00 : f32
    %314 = vector.broadcast %cst_162 : f32 to vector<8x128xf32>
    %315 = arith.maximumf %314, %286 : vector<8x128xf32>
    %316 = vector.broadcast %cst_163 : f32 to vector<8x128xf32>
    %317 = arith.minimumf %316, %315 : vector<8x128xf32>
    %c0_164 = arith.constant 0 : index
    %c0_165 = arith.constant 0 : index
    %c8_166 = arith.constant 8 : index
    %c0_167 = arith.constant 0 : index
    %318 = vector.load %arg2[%c0_164, %c0_165, %c8_166, %c0_167] : memref<1x3x16x128xf32, #tpu.memory_space<vmem>>, vector<1x1x8x128xf32>
    %319 = vector.shape_cast %318 : vector<1x1x8x128xf32> to vector<8x128xf32>
    %320 = vector.shape_cast %317 : vector<8x128xf32> to vector<1x1x8x128xf32>
    tpu.vector_store %arg2[%c0_164, %c0_165, %c8_166, %c0_167], %320 {strides = array<i32>} : memref<1x3x16x128xf32, #tpu.memory_space<vmem>>, vector<1x1x8x128xf32>,
    %cst_168 = arith.constant -3.000000e+00 : f32
    %cst_169 = arith.constant 3.000000e+00 : f32
    %321 = vector.broadcast %cst_168 : f32 to vector<8x128xf32>
    %322 = arith.maximumf %321, %313 : vector<8x128xf32>
    %323 = vector.broadcast %cst_169 : f32 to vector<8x128xf32>
    %324 = arith.minimumf %323, %322 : vector<8x128xf32>
    %c0_170 = arith.constant 0 : index
    %c1_171 = arith.constant 1 : index
    %c8_172 = arith.constant 8 : index
    %c0_173 = arith.constant 0 : index
    %325 = vector.load %arg2[%c0_170, %c1_171, %c8_172, %c0_173] : memref<1x3x16x128xf32, #tpu.memory_space<vmem>>, vector<1x1x8x128xf32>
    %326 = vector.shape_cast %325 : vector<1x1x8x128xf32> to vector<8x128xf32>
    %327 = vector.shape_cast %324 : vector<8x128xf32> to vector<1x1x8x128xf32>
    tpu.vector_store %arg2[%c0_170, %c1_171, %c8_172, %c0_173], %327 {strides = array<i32>} : memref<1x3x16x128xf32, #tpu.memory_space<vmem>>, vector<1x1x8x128xf32>,
    %cst_174 = arith.constant -3.000000e+00 : f32
    %cst_175 = arith.constant 3.000000e+00 : f32
    %328 = vector.broadcast %cst_174 : f32 to vector<8x128xf32>
    %329 = arith.maximumf %328, %260 : vector<8x128xf32>
    %330 = vector.broadcast %cst_175 : f32 to vector<8x128xf32>
    %331 = arith.minimumf %330, %329 : vector<8x128xf32>
    %c0_176 = arith.constant 0 : index
    %c2_177 = arith.constant 2 : index
    %c8_178 = arith.constant 8 : index
    %c0_179 = arith.constant 0 : index
    %332 = vector.load %arg2[%c0_176, %c2_177, %c8_178, %c0_179] : memref<1x3x16x128xf32, #tpu.memory_space<vmem>>, vector<1x1x8x128xf32>
    %333 = vector.shape_cast %332 : vector<1x1x8x128xf32> to vector<8x128xf32>
    %334 = vector.shape_cast %331 : vector<8x128xf32> to vector<1x1x8x128xf32>
    tpu.vector_store %arg2[%c0_176, %c2_177, %c8_178, %c0_179], %334 {strides = array<i32>} : memref<1x3x16x128xf32, #tpu.memory_space<vmem>>, vector<1x1x8x128xf32>,
    return
  }
  func.func @transform_0(%arg0: i32) -> (i32, i32, i32, i32) {
    %c0_i32 = arith.constant 0 : i32
    %c0_i32_0 = arith.constant 0 : i32
    %c0_i32_1 = arith.constant 0 : i32
    %c0_i32_2 = arith.constant 0 : i32
    return %arg0, %c0_i32, %c0_i32_0, %c0_i32_1 : i32, i32, i32, i32
  }
  func.func @transform_1(%arg0: i32) -> (i32, i32, i32, i32) {
    %c0_i32 = arith.constant 0 : i32
    %c0_i32_0 = arith.constant 0 : i32
    %c0_i32_1 = arith.constant 0 : i32
    %c0_i32_2 = arith.constant 0 : i32
    return %arg0, %c0_i32, %c0_i32_0, %c0_i32_1 : i32, i32, i32, i32
  }
}

</mosaic_0001>

<bundles_post_ra>
// kernel: tpu_custom_call.1
= control target key start
LH: loop header
LB: loop body
LE: loop exit
PB: predicated region body
PF: predicated region fallthrough
CT: control target
= control target key end

     0   :  { %6 = vsyncpa [#allocation4], 0  ;;  %s951_s0 = inlined_call_operand.hbm [shape: f32[2,3,16,16], index: 0, kind: input, shape index: {}]   ;;  %s952_s1 = inlined_call_operand.hbm [shape: f32[2,3,16,128], index: 1, kind: output, shape index: {}]  }
   0x1   :  { %8 = vsyncpa [#allocation4 + $0x1], 0 }
   0x2   :  { %9 = vsyncpa [#allocation5], 0 }
   0x3   :  { %11 = vsyncpa [#allocation5 + $0x1], 0  ;;  %s694_s6 = smov 0   ;;  %s696_s7 = smov 0  }
   0x4   :  { %s698_s8 = smov 0   ;;  %s700_s9 = smov 0  }
   0x5 LB: > { %s715_s10 = sadd.s32 4294967295, %s673_s9   ;;  %s496_s11 = sadd.s32 4294967294, %s673_s9   ;;  %s673_s9 = sphi %s700_s9, %s960_s9   ;;  %s669_s8 = sphi %s698_s8, %s959_s8   ;;  %s665_s7 = sphi %s696_s7, %s958_s7   ;;  %s661_s6 = sphi %s694_s6, %s957_s6  }
   0x6   : > { %s719_s12 = sadd.s32 1, %s673_s9   ;;  %s24_s13 = sadd.s32 1, %s669_s8 }
   0x7   : > { %s21_s14 = ssub.s32 %s673_s9, %s719_s12  ;;  %p31_p0 = scmp.ne.s32.totalorder %s669_s8, %s665_s7 }
   0x8   : > { %p22_p1 = scmp.eq.s32.totalorder %s21_s14, 0  ;;  %p32_p2 = scmp.eq.s32.totalorder %s673_s9, 0 }
   0x9   : > { %p37_p3 = scmp.ne.s32.totalorder %s665_s7, %s661_s6  ;;  %p38_p4 = scmp.eq.s32.totalorder %s715_s10, 0 }
   0xa   : > { %s731_s15 = scalar_select %p22_p1, %s669_s8, %s24_s13  }
   0xb   : > { %p33_p5 = por %p32_p2, %p31_p0  ;;  %p733_p6 = por %p38_p4, %p37_p3 }
   0xc   : > { %p61_p7 = scmp.eq.s32.totalorder %s715_s10, 1  ;;  %p67_p8 = scmp.eq.s32.totalorder %s496_s11, 1 }
   0xd   : > { %p498_p9 = scmp.ge.s32.totalorder %s673_s9, 2  ;;  %p534_p10 = scmp.lt.s32.totalorder %s673_s9, 2 }
   0xe   : > { %p740_p11 = por %p61_p7, %p31_p0  ;;  %p744_p12 = por %p67_p8, %p37_p3 }
   0xf   : > { %s87_s19 = sand.u32 1, %s669_s8   ;;  %s519_s20 = smul.u32 48, %s673_s9 }
  0x10   : > { %s518_s21 = smul.u32 48, %s87_s19  ;;  %p753_p13 = pnand %p534_p10, %p33_p5 }
  0x11   : > { %s96_s24 = scalar_lea.hbm %s951_s0, %s519_s20  ;;  %s88_s29 = scalar_lea.sflag [#allocation4], %s87_s19 }
  0x12   : > { %s97_s26 = sshll.u32 %s96_s24, 4  ;;  %s91_s27 = scalar_lea.vmem [#allocation3], %s518_s21  ;;  %s98_s26 = int_to_ptr.hbm [resolvable:$true] %s97_s26 }
  0x13   : > { %s99_s28 = sshll.u32 %s91_s27, 4  ;;  %s577_s30 = sshra.s32 %s98_s26, 4  ;;  %s100_s28 = int_to_ptr.vmem [resolvable:$true] %s99_s28  ;;  %s578_s30 = int_to_ptr.hbm [resolvable:$true] %s577_s30 }
  0x14   : > { %s579_s2 = scalar_lea.hbm %s578_s30, 48  ;;  %p581_p1 = pneg %p753_p13 }
  0x15   : > { %p580_p0 = scmp.ne.s32.totalorder %s578_s30, %s579_s2  ;;  %s584_s5 = scalar_lea.hbm %s951_s0, 96 }
  0x16   : > { %p585_p4 = scmp.lt.s32.totalorder %s578_s30, %s951_s0  ;;  %p586_p5 = scmp.lt.s32.totalorder %s584_s5, %s579_s2 }
  0x17   : > { %p582_p2 = pnand %p581_p1, %p580_p0 }
  0x18   : > { %p587_p7 = por %p586_p5, %p585_p4 }
  0x19   : > { %p583_p3 = pneg %p582_p2 }
  0x1b   : > { %p588_p8 = pnand %p587_p7, %p583_p3 }
  0x1d   : > { %591 = shalt.err (!%p588_p8)
}
  0x1e   : > { %s675_s14 = smov 128   ;;  %s676_s19 = smov 8  }
  0x1f   : > { %529 = dma.hbm_to_vmem [thread:$0]  (!%p753_p13), %s98_s26, 768, %s100_s28, %s88_s29, %s675_s14, %s675_s14, %s676_s19  }
  0x20   : > { %p500_p10 = scmp.ge.s32.totalorder %s673_s9, 1  ;;  %p107_p0 = scmp.lt.s32.totalorder %s673_s9, 3 }
  0x22   : > { %p108_p1 = pnand %p500_p10, %p107_p0 }
  0x23   : > { %s770_s20 = sand.u32 (!%p108_p1), 1, %s665_s7  }
  0x24   : > { %111 = sbr.rel (%p108_p1) target bundleno = 285 (0x11d), region = 24  ;;  %s114_s22 = scalar_lea.sflag (!%p108_p1), [#allocation4], %s770_s20 }
  0x25   : > { %s520_s21 = smul.u32 (!%p108_p1), 48, %s770_s20 }
  0x27   : > { %s117_s23 = scalar_lea.vmem (!%p108_p1), [#allocation3], %s520_s21 }
  0x29   : > { %652 = dma.done.wait (%p733_p6), %s114_s22, 768  }
  0x2a   : > { %654 = vsyncadd (%p733_p6), %s114_s22, 4294966528  ;;  %vm139_vm0 = vcmask 1047680   ;;  %v677_v0 = vmov 0.0   ;;  %v142_v1 = vld [vmem:[%s117_s23] sm:$0xff]  ;;  %v501_v2 = vld [vmem:[%s117_s23 + $0x10] sm:$0xff]  ;;  %vm154_vm1 = vcmask 130048  }
  0x2b   : > { %137 = vst [vmem:[#allocation2 + $0x6] sm:$0x3] %v677_v0  ;;  %v503_v3 = vld [vmem:[%s117_s23 + $0x20] sm:$0xff]  ;;  %v147_v4 = vadd.f32 %v501_v2, %v142_v1  ;;  %v143_v5 = vld [vmem:[%s117_s23 + $0x8] sm:$0xff]  ;;  %v502_v6 = vld [vmem:[%s117_s23 + $0x18] sm:$0xff]  ;;  %s678_s16 = smov 2  }
  0x2c   : > { %140 = vst.msk [vmem:[#allocation2 + $0x8] sm:$0xff] %vm139_vm0, %v677_v0  ;;  %v504_v7 = vld [vmem:[%s117_s23 + $0x28] sm:$0xff]  ;;  %v148_v8 = vadd.f32 %v502_v6, %v143_v5  ;;  %s679_s24 = smov 127   ;;  %s680_s25 = smov 1  }
  0x2d   : > { %138 = vst [vmem:[#allocation2 + $0x18] sm:$0x3] %v677_v0  ;;  %v152_v9 = vadd.f32 %v503_v3, %v147_v4  ;;  %s681_s26 = smov 126   ;;  %s895_s27 = scalar_lea.vmem [#allocation6], %s520_s21 }
  0x2e   : > { %141 = vst.msk [vmem:[#allocation2 + $0x10] sm:$0xff] %vm139_vm0, %v677_v0  ;;  %v153_v10 = vadd.f32 %v504_v7, %v148_v8  ;;  %s521_s28 = smul.u32 48, %s715_s10  ;;  %s420_s3 = sshll.u32 %s895_s27, 4  ;;  %s421_s3 = int_to_ptr.vmem [resolvable:$true] %s420_s3 }
  0x2f   : > { %155 = vst.msk [vmem:[#allocation2 + $0x8] sm:$0xff] %vm154_vm1, %v152_v9  ;;  %s408_s4 = scalar_lea.sflag [#allocation5], %s770_s20  ;;  %s627_s19 = scalar_lea.hbm %s952_s1, 96 }
  0x30   : > { %156 = vst.msk [vmem:[#allocation2 + $0x10] sm:$0xff] %vm154_vm1, %v153_v10  ;;  %s419_s2 = scalar_lea.hbm %s952_s1, %s521_s28 }
  0x31   : > { %s422_s10 = sshll.u32 %s419_s2, 4  ;;  %s423_s10 = int_to_ptr.hbm [resolvable:$true] %s422_s10 }
  0x32   : > { %s621_s5 = sshra.s32 %s423_s10, 4  ;;  %s622_s5 = int_to_ptr.hbm [resolvable:$true] %s621_s5 }
  0x33   : > { %s623_s11 = scalar_lea.hbm %s622_s5, 48  ;;  %p628_p3 = scmp.lt.s32.totalorder %s622_s5, %s952_s1 }
  0x34   : > { %p624_p6 = scmp.ne.s32.totalorder %s622_s5, %s623_s11  ;;  %p629_p4 = scmp.lt.s32.totalorder %s627_s19, %s623_s11 }
  0x36   : > { %v780_v11 = vld [vmem:[#allocation2 + $0x7] sm:$0xff]  ;;  %p625_p13 = pnand %p624_p6, %p740_p11  ;;  %p630_p5 = por %p629_p4, %p628_p3 }
  0x37   : > { %v782_v12 = vld [vmem:[#allocation2 + $0x6] sm:$0xff]  ;;  %177 = vrot.lane.b32.xlu2 %v780_v11, %s678_s16  ;;  %v804_v14 = vld [vmem:[#allocation2 + $0xe] sm:$0xff]  ;;  %v189_v44 = vmul.f32 0.6666667, %v780_v11 }
  0x38   : > { %168 = vrot.lane.b32.xlu1 %v782_v12, %s679_s24  ;;  %158 = vrot.lane.b32.xlu0 %v782_v12, %s678_s16  ;;  %v796_v13 = vld [vmem:[#allocation2 + $0x8] sm:$0xff]  ;;  %v826_v16 = vld [vmem:[#allocation2 + $0x10] sm:$0xff]  ;;  %v166_v32 = vmul.f32 -0.16666667, %v782_v12  ;;  %v292_v3 = vmul.f32 -0.16666667, %v804_v14  ;;  %p626_p2 = pneg %p625_p13 }
  0x39   : > { %v812_v15 = vld [vmem:[#allocation2 + $0xf] sm:$0xff]  ;;  %v883_v50 = vmul.f32 -1.0, %v796_v13 }
  0x3a   : > { %v840_v17 = vld [vmem:[#allocation2 + $0x9] sm:$0xff]  ;;  %v842_v18 = vld [vmem:[#allocation2 + $0x11] sm:$0xff]  ;;  %p631_p7 = pnand %p630_p5, %p626_p2 }
  0x3b   : > { %v856_v19 = vld [vmem:[#allocation2 + $0xa] sm:$0xff]  ;;  %v864_v20 = vld [vmem:[#allocation2 + $0x12] sm:$0xff] }
  0x3f   : > { %181 = vrot.lane.b32.xlu2 %v780_v11, %s680_s25 }
  0x40   : > { %172 = vrot.lane.b32.xlu1 %v782_v12, %s681_s26  ;;  %162 = vrot.lane.b32.xlu0 %v782_v12, %s680_s25 }
  0x47   : > { %202 = vrot.lane.b32.xlu2 %v796_v13, %s678_s16 }
  0x48   : > { %197 = vrot.lane.b32.xlu1 %v780_v11, %s681_s26  ;;  %191 = vrot.lane.b32.xlu0 %v780_v11, %s679_s24 }
  0x4f   : > { %288 = vrot.lane.b32.xlu2 %v804_v14, %s680_s25 }
  0x50   : > { %284 = vrot.lane.b32.xlu1 %v804_v14, %s678_s16  ;;  %206 = vrot.lane.b32.xlu0 %v796_v13, %s680_s25 }
  0x57   : > { %303 = vrot.lane.b32.xlu2 %v812_v15, %s678_s16 }
  0x58   : > { %298 = vrot.lane.b32.xlu1 %v804_v14, %s681_s26  ;;  %294 = vrot.lane.b32.xlu0 %v804_v14, %s679_s24  ;;  %v187_v14 = vmul.f32 0.5, %v780_v11 }
  0x5f   : > { %323 = vrot.lane.b32.xlu2 %v812_v15, %s681_s26 }
  0x60   : > { %317 = vrot.lane.b32.xlu1 %v812_v15, %s679_s24  ;;  %307 = vrot.lane.b32.xlu0 %v812_v15, %s680_s25 }
  0x67   : > { %217 = vrot.lane.b32.xlu2 %v796_v13, %s679_s24 }
  0x68   : > { %332 = vrot.lane.b32.xlu1 %v826_v16, %s680_s25  ;;  %328 = vrot.lane.b32.xlu0 %v826_v16, %s678_s16 }
  0x6f   : > { %350 = vrot.lane.b32.xlu2 %v826_v16, %s681_s26 }
  0x70   : > { %224 = vrot.lane.b32.xlu1 %v796_v13, %s681_s26  ;;  %343 = vrot.lane.b32.xlu0 %v826_v16, %s679_s24 }
  0x77   : > { %233 = vrot.lane.b32.xlu2 %v840_v17, %s680_s25 }
  0x78   : > { %355 = vrot.lane.b32.xlu1 %v842_v18, %s678_s16  ;;  %229 = vrot.lane.b32.xlu0 %v840_v17, %s678_s16 }
  0x7f   : > { %369 = vrot.lane.b32.xlu2 %v842_v18, %s679_s24 }
  0x80   : > { %243 = vrot.lane.b32.xlu1 %v840_v17, %s679_s24  ;;  %359 = vrot.lane.b32.xlu0 %v842_v18, %s680_s25 }
  0x87   : > { %254 = vrot.lane.b32.xlu2 %v856_v19, %s678_s16 }
  0x88   : > { %375 = vrot.lane.b32.xlu1 %v842_v18, %s681_s26  ;;  %249 = vrot.lane.b32.xlu0 %v840_v17, %s681_s26 }
  0x8f   : > { %384 = vrot.lane.b32.xlu2 %v864_v20, %s680_s25 }
  0x90   : > { %258 = vrot.lane.b32.xlu1 %v856_v19, %s680_s25  ;;  %380 = vrot.lane.b32.xlu0 %v864_v20, %s678_s16 }
  0x91   : > { %v178_v21 = vpop.permute.xlu2 %177 }
  0x92   : > { %v179_v41 = vmul.f32 0.16666667, %v178_v21 }
  0x97   : > { %268 = vrot.lane.b32.xlu2 %v856_v19, %s681_s26 }
  0x98   : > { %390 = vrot.lane.b32.xlu1 %v864_v20, %s679_s24  ;;  %264 = vrot.lane.b32.xlu0 %v856_v19, %s679_s24 }
  0x99   : > { %v182_v22 = vpop.permute.xlu2 %181 }
  0x9a   : > { %v185_v43 = vmul.f32 -0.5, %v182_v22 }
  0xa0   : > { %394 = vrot.lane.b32.xlu0 %v864_v20, %s681_s26 }
  0xa1   : > { %v203_v23 = vpop.permute.xlu2 %202 }
  0xa2   : > { %v204_v57 = vmul.f32 -0.16666667, %v203_v23 }
  0xa9   : > { %v289_v24 = vpop.permute.xlu2 %288 }
  0xaa   : > { %v169_v25 = vpop.permute.xlu1 %168  ;;  %v159_v26 = vpop.permute.xlu0 %158  ;;  %v290_v58 = vmul.f32 0.16666667, %v289_v24 }
  0xab   : > { %v160_v30 = vmul.f32 -0.083333336, %v159_v26  ;;  %v170_v34 = vmul.f32 0.16666667, %v169_v25  ;;  %v183_v26 = vmul.f32 -0.25, %v182_v22 }
  0xb1   : > { %v304_v27 = vpop.permute.xlu2 %303 }
  0xb2   : > { %v173_v28 = vpop.permute.xlu1 %172  ;;  %v163_v29 = vpop.permute.xlu0 %162  ;;  %v305_v12 = vmul.f32 0.16666667, %v304_v27 }
  0xb3   : > { %v164_v31 = vmul.f32 0.16666667, %v163_v29  ;;  %v174_v35 = vmul.f32 -0.083333336, %v173_v28  ;;  %v315_v29 = vmul.f32 0.6666667, %v812_v15 }
  0xb5   : > { %v165_v33 = vadd.f32 %v164_v31, %v160_v30  ;;  %v188_v31 = vadd.f32 %v187_v14, %v183_v26 }
  0xb7   : > { %v167_v36 = vadd.f32 %v166_v32, %v165_v33 }
  0xb9   : > { %v171_v37 = vadd.f32 %v170_v34, %v167_v36  ;;  %v324_v38 = vpop.permute.xlu2 %323 }
  0xba   : > { %v198_v39 = vpop.permute.xlu1 %197  ;;  %v192_v40 = vpop.permute.xlu0 %191  ;;  %v325_v11 = vmul.f32 0.16666667, %v324_v38 }
  0xbb   : > { %v175_v42 = vadd.f32 %v174_v35, %v171_v37  ;;  %v195_v48 = vmul.f32 -0.5, %v192_v40  ;;  %v199_v53 = vmul.f32 0.16666667, %v198_v39  ;;  %v193_v32 = vmul.f32 -0.25, %v192_v40 }
  0xbc   : > { %v339_v35 = vmul.f32 -1.0, %v826_v16 }
  0xbd   : > { %v180_v45 = vadd.f32 %v179_v41, %v175_v42  ;;  %v194_v39 = vadd.f32 %v193_v32, %v188_v31  ;;  %v313_v42 = vmul.f32 0.5, %v812_v15 }
  0xbf   : > { %v186_v46 = vadd.f32 %v185_v43, %v180_v45 }
  0xc1   : > { %v190_v47 = vadd.f32 %v189_v44, %v186_v46  ;;  %v885_v51 = vpop.permute.xlu2 %217 }
  0xc2   : > { %v285_v49 = vpop.permute.xlu1 %284  ;;  %v207_v52 = vpop.permute.xlu0 %206  ;;  %v888_v55 = vmul.f32 0.5, %v885_v51 }
  0xc3   : > { %v196_v54 = vadd.f32 %v195_v48, %v190_v47  ;;  %v208_v56 = vmul.f32 0.5, %v207_v52  ;;  %v286_v60 = vmul.f32 -0.083333336, %v285_v49  ;;  %v210_v40 = vmul.f32 0.6666667, %v207_v52 }
  0xc4   : > { %v221_v52 = vmul.f32 0.6666667, %v885_v51 }
  0xc5   : > { %v200_v59 = vadd.f32 %v199_v53, %v196_v54  ;;  %v216_v61 = vadd.f32 %v883_v50, %v208_v56  ;;  %v291_v0 = vadd.f32 %v290_v58, %v286_v60  ;;  %v209_v46 = vadd.f32 %v208_v56, %v194_v39 }
  0xc7   : > { %v205_v62 = vadd.f32 %v204_v57, %v200_v59  ;;  %v223_v63 = vadd.f32 %v888_v55, %v216_v61  ;;  %v293_v5 = vadd.f32 %v292_v3, %v291_v0  ;;  %v214_v57 = vadd.f32 %v883_v50, %v209_v46 }
  0xc9   : > { %v508_v1 = vclamps-f32 %v223_v63, 3.0  ;;  %v351_v23 = vpop.permute.xlu2 %350  ;;  %v211_v58 = vadd.f32 %v210_v40, %v205_v62  ;;  %v220_v56 = vadd.f32 %v888_v55, %v214_v57  ;;  %v365_v55 = vmul.f32 0.5, %v842_v18 }
  0xca   : > { %v299_v2 = vpop.permute.xlu1 %298  ;;  %v295_v4 = vpop.permute.xlu0 %294  ;;  %v352_v26 = vmul.f32 -0.16666667, %v351_v23 }
  0xcb   : > { %509 = vst [vmem:[%s895_s27 + $0x20] sm:$0xff] %v508_v1  ;;  %v296_v6 = vmul.f32 0.16666667, %v295_v4  ;;  %v300_v7 = vmul.f32 -0.083333336, %v299_v2  ;;  %v215_v1 = vadd.f32 %v883_v50, %v211_v58  ;;  %v239_v4 = vmul.f32 0.5, %v840_v17 }
  0xcd   : > { %v297_v8 = vadd.f32 %v296_v6, %v293_v5  ;;  %v222_v6 = vadd.f32 %v221_v52, %v215_v1 }
  0xcf   : > { %v301_v13 = vadd.f32 %v300_v7, %v297_v8 }
  0xd1   : > { %v306_v24 = vadd.f32 %v305_v12, %v301_v13  ;;  %v234_v41 = vpop.permute.xlu2 %233 }
  0xd2   : > { %v318_v9 = vpop.permute.xlu1 %317  ;;  %v308_v10 = vpop.permute.xlu0 %307  ;;  %v235_v15 = vmul.f32 -0.25, %v234_v41  ;;  %v237_v14 = vmul.f32 -0.5, %v234_v41 }
  0xd3   : > { %v311_v21 = vmul.f32 -0.5, %v308_v10  ;;  %v321_v33 = vmul.f32 -0.5, %v318_v9  ;;  %v309_v43 = vmul.f32 -0.25, %v308_v10  ;;  %v319_v48 = vmul.f32 -0.25, %v318_v9 }
  0xd4   : > { %v236_v3 = vadd.f32 %v235_v15, %v220_v56 }
  0xd5   : > { %v312_v30 = vadd.f32 %v311_v21, %v306_v24  ;;  %v314_v49 = vadd.f32 %v313_v42, %v309_v43 }
  0xd6   : > { %v240_v12 = vadd.f32 %v239_v4, %v236_v3 }
  0xd7   : > { %v316_v34 = vadd.f32 %v315_v29, %v312_v30  ;;  %v320_v38 = vadd.f32 %v319_v48, %v314_v49 }
  0xd9   : > { %v322_v44 = vadd.f32 %v321_v33, %v316_v34  ;;  %v370_v61 = vpop.permute.xlu2 %369 }
  0xda   : > { %v333_v25 = vpop.permute.xlu1 %332  ;;  %v329_v28 = vpop.permute.xlu0 %328  ;;  %v371_v33 = vmul.f32 -0.25, %v370_v61 }
  0xdb   : > { %v334_v36 = vmul.f32 0.5, %v333_v25  ;;  %v326_v53 = vadd.f32 %v325_v11, %v322_v44  ;;  %v330_v16 = vmul.f32 -0.16666667, %v329_v28  ;;  %v336_v63 = vmul.f32 0.6666667, %v333_v25 }
  0xdd   : > { %v342_v27 = vadd.f32 %v339_v35, %v334_v36  ;;  %v331_v0 = vadd.f32 %v330_v16, %v326_v53  ;;  %v335_v2 = vadd.f32 %v334_v36, %v320_v38 }
  0xdf   : > { %v337_v5 = vadd.f32 %v336_v63, %v331_v0  ;;  %v340_v7 = vadd.f32 %v339_v35, %v335_v2 }
  0xe1   : > { %v341_v51 = vadd.f32 %v339_v35, %v337_v5  ;;  %v255_v29 = vpop.permute.xlu2 %254 }
  0xe2   : > { %v225_v37 = vpop.permute.xlu1 %224  ;;  %v344_v22 = vpop.permute.xlu0 %343 }
  0xe3   : > { %v345_v45 = vmul.f32 0.5, %v344_v22  ;;  %v226_v62 = vmul.f32 -0.16666667, %v225_v37  ;;  %v347_v8 = vmul.f32 0.6666667, %v344_v22 }
  0xe4   : > { %v241_v37 = vmul.f32 0.6666667, %v840_v17  ;;  %v373_v17 = vmul.f32 -0.5, %v370_v61 }
  0xe5   : > { %v349_v47 = vadd.f32 %v345_v45, %v342_v27  ;;  %v227_v24 = vadd.f32 %v226_v62, %v222_v6  ;;  %v346_v50 = vadd.f32 %v345_v45, %v340_v7  ;;  %v348_v30 = vadd.f32 %v347_v8, %v341_v51 }
  0xe6   : > { %v388_v7 = vmul.f32 -0.16666667, %v864_v20 }
  0xe7   : > { %v513_v54 = vclamps-f32 %v349_v47, 3.0  ;;  %v353_v39 = vadd.f32 %v352_v26, %v348_v30  ;;  %v367_v47 = vmul.f32 0.6666667, %v842_v18  ;;  %v262_v18 = vmul.f32 -0.16666667, %v856_v19 }
  0xe9   : > { %514 = vst [vmem:[%s895_s27 + $0x28] sm:$0xff] %v513_v54  ;;  %v385_v48 = vpop.permute.xlu2 %384  ;;  %v256_v54 = vmul.f32 -0.083333336, %v255_v29 }
  0xea   : > { %v356_v59 = vpop.permute.xlu1 %355  ;;  %v230_v60 = vpop.permute.xlu0 %229  ;;  %v386_v2 = vmul.f32 0.16666667, %v385_v48 }
  0xeb   : > { %v231_v9 = vmul.f32 0.16666667, %v230_v60  ;;  %v357_v36 = vmul.f32 0.16666667, %v356_v59 }
  0xed   : > { %v232_v31 = vadd.f32 %v231_v9, %v227_v24  ;;  %v358_v41 = vadd.f32 %v357_v36, %v353_v39 }
  0xef   : > { %v238_v42 = vadd.f32 %v237_v14, %v232_v31 }
  0xf1   : > { %v242_v45 = vadd.f32 %v241_v37, %v238_v42  ;;  %v269_v52 = vpop.permute.xlu2 %268 }
  0xf2   : > { %v244_v10 = vpop.permute.xlu1 %243  ;;  %v360_v21 = vpop.permute.xlu0 %359  ;;  %v270_v5 = vmul.f32 -0.083333336, %v269_v52 }
  0xf3   : > { %v245_v13 = vmul.f32 -0.25, %v244_v10  ;;  %v361_v25 = vmul.f32 -0.25, %v360_v21  ;;  %v363_v35 = vmul.f32 -0.5, %v360_v21  ;;  %v247_v43 = vmul.f32 -0.5, %v244_v10 }
  0xf5   : > { %v246_v28 = vadd.f32 %v245_v13, %v240_v12  ;;  %v362_v32 = vadd.f32 %v361_v25, %v346_v50  ;;  %v364_v46 = vadd.f32 %v363_v35, %v358_v41  ;;  %v248_v49 = vadd.f32 %v247_v43, %v242_v45 }
  0xf7   : > { %v505_v34 = vclamps-f32 %v246_v28, 3.0  ;;  %v366_v27 = vadd.f32 %v365_v55, %v362_v32  ;;  %v368_v53 = vadd.f32 %v367_v47, %v364_v46 }
  0xf9   : > { %274 = vst [vmem:[%s895_s27] sm:$0xff] %v505_v34  ;;  %v372_v22 = vadd.f32 %v371_v33, %v366_v27  ;;  %v374_v60 = vadd.f32 %v373_v17, %v368_v53 }
  0xfa   : > { %v376_v11 = vpop.permute.xlu1 %375  ;;  %v250_v23 = vpop.permute.xlu0 %249 }
  0xfb   : > { %v510_v44 = vclamps-f32 %v372_v22, 3.0  ;;  %v251_v40 = vmul.f32 0.16666667, %v250_v23  ;;  %v377_v59 = vmul.f32 0.16666667, %v376_v11 }
  0xfd   : > { %400 = vst [vmem:[%s895_s27 + $0x8] sm:$0xff] %v510_v44  ;;  %v252_v16 = vadd.f32 %v251_v40, %v248_v49  ;;  %v378_v0 = vadd.f32 %v377_v59, %v374_v60 }
  0xff   : > { %v257_v38 = vadd.f32 %v256_v54, %v252_v16 }
 0x102   : > { %v259_v57 = vpop.permute.xlu1 %258  ;;  %v381_v58 = vpop.permute.xlu0 %380 }
 0x103   : > { %v260_v15 = vmul.f32 0.16666667, %v259_v57  ;;  %v382_v63 = vmul.f32 -0.083333336, %v381_v58 }
 0x105   : > { %v261_v56 = vadd.f32 %v260_v15, %v257_v38  ;;  %v383_v1 = vadd.f32 %v382_v63, %v378_v0 }
 0x107   : > { %v263_v61 = vadd.f32 %v262_v18, %v261_v56  ;;  %v387_v6 = vadd.f32 %v386_v2, %v383_v1 }
 0x109   : > { %v389_v19 = vadd.f32 %v388_v7, %v387_v6 }
 0x10a   : > { %v265_v3 = vpop.permute.xlu0 %264  ;;  %v391_v62 = vpop.permute.xlu1 %390 }
 0x10b   : > { %v266_v4 = vmul.f32 0.16666667, %v265_v3  ;;  %v392_v9 = vmul.f32 0.16666667, %v391_v62 }
 0x10d   : > { %v267_v8 = vadd.f32 %v266_v4, %v263_v61  ;;  %v393_v21 = vadd.f32 %v392_v9, %v389_v19 }
 0x10f   : > { %v271_v10 = vadd.f32 %v270_v5, %v267_v8 }
 0x111   : > { %v506_v12 = vclamps-f32 %v271_v10, 3.0 }
 0x112   : > { %v395_v13 = vpop.permute.xlu0 %394 }
 0x113   : > { %507 = vst [vmem:[%s895_s27 + $0x10] sm:$0xff] %v506_v12  ;;  %v396_v55 = vmul.f32 -0.083333336, %v395_v13 }
 0x115   : > { %v397_v24 = vadd.f32 %v396_v55, %v393_v21 }
 0x117   : > { %v511_v20 = vclamps-f32 %v397_v24, 3.0 }
 0x119   : > { %512 = vst [vmem:[%s895_s27 + $0x18] sm:$0xff] %v511_v20 }
 0x11a   : > { %634 = shalt.err (!%p631_p7)
}
 0x11b   : > { %s682_s20 = smov 128   ;;  %s683_s23 = smov 8  }
 0x11c   : > { %524 = dma.vmem_to_hbm [thread:$0]  (%p740_p11), %s421_s3, 768, %s423_s10, %s408_s4, %s682_s20, %s682_s20, %s683_s23  }
 0x11d PF: > { %s437_s16 = sand.u32 1, %s661_s6   ;;  %p531_p8 = pnand %p498_p9, %p744_p12 }
 0x11e   : > { %s438_s24 = scalar_lea.sflag [#allocation5], %s437_s16 }
 0x11f   : > { %p532_p10 = pneg %p531_p8 }
 0x121   : > { %656 = dma.done.wait (%p532_p10), %s438_s24, 768  }
 0x122   : > { %658 = vsyncadd (%p532_p10), %s438_s24, 4294966528  ;;  %p14_p0 = scmp.ge.s32.totalorder %s719_s12, 4   ;;  %s957_s6 = smov %s665_s7 }
 0x123   : > { %s958_s7 = smov %s669_s8  ;;  %s959_s8 = smov %s731_s15 }
 0x124   : > { %s960_s9 = smov %s719_s12  ;;  %16 = sbr.rel (!%p14_p0) target bundleno = 5 (0x5), region = 73 }
 0x129   :  { %444 = vsyncpa [#allocation4], 1 }
 0x12a   :  { %446 = vsyncpa [#allocation4 + $0x1], 1 }
 0x12b   :  { %447 = vsyncpa [#allocation5], 1 }
 0x12c   :  { %449 = vsyncpa [#allocation5 + $0x1], 1 }

</bundles_post_ra>
